<compile_context>
chip_gen: v7x
topology: tpu7x:2x2x1
jax: 0.10.0
libtpu: 0.0.40
codegen_flags: <defaults>
</compile_context>

<pallas_src>
import functools

import jax
import jax.numpy as jnp
from jax.experimental import pallas as pl
from jax.experimental.pallas import tpu as pltpu

EPS = 1e-5


def prenorm_kernel(x_ref, w_ref, p_ref, o_ref, *, d_real):
    d_pad = w_ref.shape[-1]

    # block(x): Linear(dim, dim) -> y = x @ W + b.
    # x arrives as f32 (no extra host cast pass); cast to bf16 in VMEM to feed
    # the MXU, accumulate in f32.
    x = x_ref[...].astype(jnp.bfloat16)
    y = jnp.dot(x, w_ref[...], preferred_element_type=jnp.float32)

    bias = p_ref[0:1, :]     # (1, Dp) f32; zero in padded lanes
    gamma = p_ref[1:2, :]    # (1, Dp) f32; zero in padded lanes
    beta = p_ref[2:3, :]     # (1, Dp) f32; zero in padded lanes
    y = y + bias             # padded lanes stay exactly 0

    # LayerNorm over the real hidden dim (biased variance, eps=1e-5), f32.
    # Padded lanes of y are exactly 0 (zero W columns + zero bias), so the mean
    # sum over Dp lanes divided by d_real is exact.
    inv_d = jnp.float32(1.0 / d_real)
    mean = jnp.sum(y, axis=-1, keepdims=True) * inv_d

    # Exactly-centered variance: mask the padded lanes (they would otherwise
    # contribute mean^2 each).  The select is a cheap VPU op; kernel is
    # HBM-bound.  Skipped entirely when D is already 128-aligned.
    yc = y - mean
    if d_pad != d_real:
        lane = jax.lax.broadcasted_iota(jnp.int32, yc.shape, dimension=1)
        yc = jnp.where(lane < d_real, yc, jnp.float32(0.0))
    var = jnp.sum(yc * yc, axis=-1, keepdims=True) * inv_d
    normed = yc * jax.lax.rsqrt(var + EPS)

    # gamma/beta are 0 in padded lanes -> padded output columns are exactly 0.
    o_ref[...] = (normed * gamma + beta).astype(o_ref.dtype)


def _call_prenorm(x2, w_p, params, *, tm, M, D, Dp, out_dtype, vmem_ceiling,
                  single_buffer_consts):
    out_itemsize = jnp.dtype(out_dtype).itemsize
    buf_w = 1 if single_buffer_consts else 2
    est = (2 * tm * D * 4                 # f32 x tiles (double-buffered)
           + 2 * tm * Dp * out_itemsize   # out tiles (double-buffered)
           + buf_w * D * Dp * 2           # bf16 weight (resident)
           + buf_w * 3 * Dp * 4)          # packed bias/gamma/beta (f32)
    vmem_limit = int(min(max(est + (4 << 20), 32 << 20), vmem_ceiling))
    vmem_limit = max(vmem_limit, est + (2 << 20))  # never below the real need

    # Constant-index_map operands never change across the row grid -> single
    # buffer them when the runtime supports pl.Buffered(1).
    const_kwargs = (dict(pipeline_mode=pl.Buffered(1))
                    if single_buffer_consts else {})

    return pl.pallas_call(
        functools.partial(prenorm_kernel, d_real=D),
        out_shape=jax.ShapeDtypeStruct((M, Dp), out_dtype),
        grid_spec=pltpu.PrefetchScalarGridSpec(
            num_scalar_prefetch=0,
            grid=(pl.cdiv(M, tm),),
            in_specs=[
                pl.BlockSpec((tm, D), lambda i: (i, 0)),                 # f32 x rows
                pl.BlockSpec((D, Dp), lambda i: (0, 0), **const_kwargs),  # bf16 weight
                pl.BlockSpec((3, Dp), lambda i: (0, 0), **const_kwargs),  # LN params
            ],
            out_specs=pl.BlockSpec((tm, Dp), lambda i: (i, 0)),
        ),
        compiler_params=pltpu.CompilerParams(
            dimension_semantics=("parallel",),
            vmem_limit_bytes=vmem_limit),
    )(x2, w_p, params)


def prenorm(x, w, b, gamma, beta, *, tm=512, out_dtype=None):
    """x: (B, N, D); w: (D, D) stored (in, out); b/gamma/beta: (D,).

    Returns (B, N, D) in `out_dtype` (defaults to x.dtype; pass jnp.bfloat16
    to halve output HBM traffic when the consumer accepts it).
    """
    B, N, D = x.shape
    M = B * N
    out_dtype = x.dtype if out_dtype is None else out_dtype
    out_itemsize = jnp.dtype(out_dtype).itemsize

    # Lane-dense output hidden dim (multiple of 128).
    Dp = max(128, pl.cdiv(D, 128) * 128)

    # Row tile: multiple of 8; shrink for small M so the parallel grid has
    # >= 2 steps (two v7x TensorCores), shrink further if VMEM would overflow.
    tm = max(8, pl.cdiv(tm, 8) * 8)
    tm = min(tm, max(8, pl.cdiv(max(M // 2, 1), 8) * 8))

    # Per-generation VMEM budget (v5e/v6e: 128 MiB physical, v7x: 64 MiB).
    try:
        vmem_cap = int(pltpu.get_tpu_info().vmem_capacity_bytes)
    except Exception:  # pragma: no cover - fall back to smallest (v7x) VMEM
        vmem_cap = 64 << 20
    vmem_ceiling = (vmem_cap * 3) // 4   # ~96 MiB on v5e/v6e, ~48 MiB on v7x

    def _worst_case_est(t):
        return (2 * t * D * 4 + 2 * t * Dp * out_itemsize
                + 2 * D * Dp * 2 + 2 * 3 * Dp * 4)

    while tm > 64 and _worst_case_est(tm) + (4 << 20) > vmem_ceiling:
        tm = max(64, pl.cdiv(tm // 2, 8) * 8)

    # No pad, no cast on x: plain contiguous reshape only.
    x2 = x.reshape(M, D)
    # Weight padded on the output-column side only; zero padded columns (and
    # zero padded bias/gamma/beta) keep the padded output lanes exactly 0.
    w_p = jnp.pad(w, ((0, 0), (0, Dp - D))).astype(jnp.bfloat16)
    params = jnp.stack([
        jnp.pad(b.astype(jnp.float32), (0, Dp - D)),
        jnp.pad(gamma.astype(jnp.float32), (0, Dp - D)),
        jnp.pad(beta.astype(jnp.float32), (0, Dp - D)),
    ])

    kwargs = dict(tm=tm, M=M, D=D, Dp=Dp, out_dtype=out_dtype,
                  vmem_ceiling=vmem_ceiling)
    try:
        out = _call_prenorm(x2, w_p, params, single_buffer_consts=True, **kwargs)
    except Exception:  # pragma: no cover - pl.Buffered(1) unsupported -> default buffering
        out = _call_prenorm(x2, w_p, params, single_buffer_consts=False, **kwargs)

    if Dp != D:
        out = out[:, :D]
    return out.reshape(B, N, D)


def prenorm_reference(x, w, b, gamma, beta):
    # Same numerics as the kernel: bf16 matmul inputs, f32 accumulation,
    # f32 centered-variance LayerNorm.
    y = jnp.einsum("bnd,de->bne",
                   x.astype(jnp.bfloat16), w.astype(jnp.bfloat16),
                   preferred_element_type=jnp.float32) + b.astype(jnp.float32)
    mean = jnp.mean(y, axis=-1, keepdims=True)
    var = jnp.mean((y - mean) ** 2, axis=-1, keepdims=True)
    return (y - mean) / jnp.sqrt(var + EPS) * gamma + beta


if __name__ == "__main__":
    B, N, D = 2, 8, 32  # batch=2, seq=8, hidden dim=32

    key = jax.random.PRNGKey(0)
    kx, kw, kb = jax.random.split(key, 3)

    x = jax.random.normal(kx, (B, N, D), dtype=jnp.float32)

    # block = Linear(D, D): deterministic init
    w = jax.random.normal(kw, (D, D), dtype=jnp.float32) / jnp.sqrt(D)
    b = jax.random.normal(kb, (D,), dtype=jnp.float32) * 0.1

    # LayerNorm(D) params: PyTorch default init (ones / zeros)
    gamma = jnp.ones((D,), dtype=jnp.float32)
    beta = jnp.zeros((D,), dtype=jnp.float32)

    out = prenorm(x, w, b, gamma, beta)
    out = jax.block_until_ready(out)

    ref = prenorm_reference(x, w, b, gamma, beta)
    assert out.shape == (B, N, D)
    assert jnp.allclose(out, ref, atol=1e-2, rtol=1e-2), "mismatch vs reference"

    print("KERNEL_OK")
</pallas_src>

<mosaic_0001>
module attributes {stable_mosaic.version = 11 : i64} {
  func.func @prenorm_kernel(%arg0: i32, %arg1: memref<8x32xf32, #tpu.memory_space<vmem>>, %arg2: memref<32x128xbf16, #tpu.memory_space<vmem>>, %arg3: memref<3x128xf32, #tpu.memory_space<vmem>>, %arg4: memref<8x128xf32, #tpu.memory_space<vmem>>) attributes {dimension_semantics = [#tpu.dimension_semantics<parallel>], iteration_bounds = array<i64: 2>, scalar_prefetch = 0 : i64, scratch_operands = 0 : i64, tpu.core_type = #tpu.core_type<tc>, window_params = [{transform_indices = @transform_0, window_bounds = array<i64: 8, 32>}, {pipeline_mode = #tpu.pipeline_mode<synchronous>, transform_indices = @transform_1, window_bounds = array<i64: 32, 128>}, {pipeline_mode = #tpu.pipeline_mode<synchronous>, transform_indices = @transform_2, window_bounds = array<i64: 3, 128>}, {transform_indices = @transform_3, window_bounds = array<i64: 8, 128>}]} {
    %c0 = arith.constant 0 : index
    %c0_0 = arith.constant 0 : index
    %0 = vector.load %arg1[%c0, %c0_0] : memref<8x32xf32, #tpu.memory_space<vmem>>, vector<8x32xf32>
    %1 = arith.truncf %0 : vector<8x32xf32> to vector<8x32xbf16>
    %c0_1 = arith.constant 0 : index
    %c0_2 = arith.constant 0 : index
    %2 = vector.load %arg2[%c0_1, %c0_2] : memref<32x128xbf16, #tpu.memory_space<vmem>>, vector<32x128xbf16>
    %cst = arith.constant dense<0.000000e+00> : vector<8x128xf32>
    %3 = tpu.matmul %1, %2, %cst {dimension_numbers = #tpu.dot_dimension_numbers<[1], [0], [0], [1], [0, 0, 1, 1], [], []>} : vector<8x32xbf16>, vector<32x128xbf16>, vector<8x128xf32> -> vector<8x128xf32>
    %c0_3 = arith.constant 0 : index
    %c0_4 = arith.constant 0 : index
    %4 = vector.load %arg3[%c0_3, %c0_4] : memref<3x128xf32, #tpu.memory_space<vmem>>, vector<1x128xf32>
    %c1 = arith.constant 1 : index
    %c0_5 = arith.constant 0 : index
    %5 = vector.load %arg3[%c1, %c0_5] : memref<3x128xf32, #tpu.memory_space<vmem>>, vector<1x128xf32>
    %c2 = arith.constant 2 : index
    %c0_6 = arith.constant 0 : index
    %6 = vector.load %arg3[%c2, %c0_6] : memref<3x128xf32, #tpu.memory_space<vmem>>, vector<1x128xf32>
    %7 = vector.broadcast %4 : vector<1x128xf32> to vector<8x128xf32>
    %8 = arith.addf %3, %7 : vector<8x128xf32>
    %cst_7 = arith.constant dense<0.000000e+00> : vector<8xf32>
    %9 = vector.multi_reduction <add>, %8, %cst_7 [1] : vector<8x128xf32> to vector<8xf32>
    %10 = vector.shape_cast %9 : vector<8xf32> to vector<8x1xf32>
    %cst_8 = arith.constant 3.125000e-02 : f32
    %11 = vector.broadcast %cst_8 : f32 to vector<8x1xf32>
    %12 = arith.mulf %10, %11 : vector<8x1xf32>
    %13 = vector.broadcast %12 : vector<8x1xf32> to vector<8x128xf32>
    %14 = arith.subf %8, %13 : vector<8x128xf32>
    %15 = tpu.iota {dimensions = array<i32: 1>} : vector<8x128xi32>
    %c32_i32 = arith.constant 32 : i32
    %16 = vector.broadcast %c32_i32 : i32 to vector<8x128xi32>
    %17 = arith.cmpi slt, %15, %16 : vector<8x128xi32>
    %cst_9 = arith.constant 0.000000e+00 : f32
    %18 = vector.broadcast %cst_9 : f32 to vector<8x128xf32>
    %19 = arith.select %17, %14, %18 : vector<8x128xi1>, vector<8x128xf32>
    %20 = arith.mulf %19, %19 : vector<8x128xf32>
    %cst_10 = arith.constant dense<0.000000e+00> : vector<8xf32>
    %21 = vector.multi_reduction <add>, %20, %cst_10 [1] : vector<8x128xf32> to vector<8xf32>
    %22 = vector.shape_cast %21 : vector<8xf32> to vector<8x1xf32>
    %cst_11 = arith.constant 3.125000e-02 : f32
    %23 = vector.broadcast %cst_11 : f32 to vector<8x1xf32>
    %24 = arith.mulf %22, %23 : vector<8x1xf32>
    %cst_12 = arith.constant 9.99999974E-6 : f32
    %25 = vector.broadcast %cst_12 : f32 to vector<8x1xf32>
    %26 = arith.addf %24, %25 : vector<8x1xf32>
    %27 = math.rsqrt %26 : vector<8x1xf32>
    %28 = vector.broadcast %27 : vector<8x1xf32> to vector<8x128xf32>
    %29 = arith.mulf %19, %28 : vector<8x128xf32>
    %30 = vector.broadcast %5 : vector<1x128xf32> to vector<8x128xf32>
    %31 = arith.mulf %29, %30 : vector<8x128xf32>
    %32 = vector.broadcast %6 : vector<1x128xf32> to vector<8x128xf32>
    %33 = arith.addf %31, %32 : vector<8x128xf32>
    %c0_13 = arith.constant 0 : index
    %c0_14 = arith.constant 0 : index
    %34 = vector.load %arg4[%c0_13, %c0_14] : memref<8x128xf32, #tpu.memory_space<vmem>>, vector<8x128xf32>
    tpu.vector_store %arg4[%c0_13, %c0_14], %33 {strides = array<i32>} : memref<8x128xf32, #tpu.memory_space<vmem>>, vector<8x128xf32>,
    return
  }
  func.func @transform_0(%arg0: i32) -> (i32, i32) {
    %c0_i32 = arith.constant 0 : i32
    %c0_i32_0 = arith.constant 0 : i32
    return %arg0, %c0_i32 : i32, i32
  }
  func.func @transform_1(%arg0: i32) -> (i32, i32) {
    %c0_i32 = arith.constant 0 : i32
    %c0_i32_0 = arith.constant 0 : i32
    %c0_i32_1 = arith.constant 0 : i32
    return %c0_i32, %c0_i32_0 : i32, i32
  }
  func.func @transform_2(%arg0: i32) -> (i32, i32) {
    %c0_i32 = arith.constant 0 : i32
    %c0_i32_0 = arith.constant 0 : i32
    %c0_i32_1 = arith.constant 0 : i32
    return %c0_i32, %c0_i32_0 : i32, i32
  }
  func.func @transform_3(%arg0: i32) -> (i32, i32) {
    %c0_i32 = arith.constant 0 : i32
    %c0_i32_0 = arith.constant 0 : i32
    return %arg0, %c0_i32 : i32, i32
  }
}

module attributes {stable_mosaic.version = 11 : i64} {
  func.func @prenorm_kernel(%arg0: i32, %arg1: memref<8x32xf32, #tpu.memory_space<vmem>>, %arg2: memref<32x128xbf16, #tpu.memory_space<vmem>>, %arg3: memref<3x128xf32, #tpu.memory_space<vmem>>, %arg4: memref<8x128xf32, #tpu.memory_space<vmem>>) attributes {dimension_semantics = [#tpu.dimension_semantics<parallel>], iteration_bounds = array<i64: 2>, scalar_prefetch = 0 : i64, scratch_operands = 0 : i64, tpu.core_type = #tpu.core_type<tc>, window_params = [{transform_indices = @transform_0, window_bounds = array<i64: 8, 32>}, {pipeline_mode = #tpu.pipeline_mode<synchronous>, transform_indices = @transform_1, window_bounds = array<i64: 32, 128>}, {pipeline_mode = #tpu.pipeline_mode<synchronous>, transform_indices = @transform_2, window_bounds = array<i64: 3, 128>}, {transform_indices = @transform_3, window_bounds = array<i64: 8, 128>}]} {
    %c0 = arith.constant 0 : index
    %c0_0 = arith.constant 0 : index
    %0 = vector.load %arg1[%c0, %c0_0] : memref<8x32xf32, #tpu.memory_space<vmem>>, vector<8x32xf32>
    %1 = arith.truncf %0 : vector<8x32xf32> to vector<8x32xbf16>
    %c0_1 = arith.constant 0 : index
    %c0_2 = arith.constant 0 : index
    %2 = vector.load %arg2[%c0_1, %c0_2] : memref<32x128xbf16, #tpu.memory_space<vmem>>, vector<32x128xbf16>
    %cst = arith.constant dense<0.000000e+00> : vector<8x128xf32>
    %3 = tpu.matmul %1, %2, %cst {dimension_numbers = #tpu.dot_dimension_numbers<[1], [0], [0], [1], [0, 0, 1, 1], [], []>} : vector<8x32xbf16>, vector<32x128xbf16>, vector<8x128xf32> -> vector<8x128xf32>
    %c0_3 = arith.constant 0 : index
    %c0_4 = arith.constant 0 : index
    %4 = vector.load %arg3[%c0_3, %c0_4] : memref<3x128xf32, #tpu.memory_space<vmem>>, vector<1x128xf32>
    %c1 = arith.constant 1 : index
    %c0_5 = arith.constant 0 : index
    %5 = vector.load %arg3[%c1, %c0_5] : memref<3x128xf32, #tpu.memory_space<vmem>>, vector<1x128xf32>
    %c2 = arith.constant 2 : index
    %c0_6 = arith.constant 0 : index
    %6 = vector.load %arg3[%c2, %c0_6] : memref<3x128xf32, #tpu.memory_space<vmem>>, vector<1x128xf32>
    %7 = vector.broadcast %4 : vector<1x128xf32> to vector<8x128xf32>
    %8 = arith.addf %3, %7 : vector<8x128xf32>
    %cst_7 = arith.constant dense<0.000000e+00> : vector<8xf32>
    %9 = vector.multi_reduction <add>, %8, %cst_7 [1] : vector<8x128xf32> to vector<8xf32>
    %10 = vector.shape_cast %9 : vector<8xf32> to vector<8x1xf32>
    %cst_8 = arith.constant 3.125000e-02 : f32
    %11 = vector.broadcast %cst_8 : f32 to vector<8x1xf32>
    %12 = arith.mulf %10, %11 : vector<8x1xf32>
    %13 = vector.broadcast %12 : vector<8x1xf32> to vector<8x128xf32>
    %14 = arith.subf %8, %13 : vector<8x128xf32>
    %15 = tpu.iota {dimensions = array<i32: 1>} : vector<8x128xi32>
    %c32_i32 = arith.constant 32 : i32
    %16 = vector.broadcast %c32_i32 : i32 to vector<8x128xi32>
    %17 = arith.cmpi slt, %15, %16 : vector<8x128xi32>
    %cst_9 = arith.constant 0.000000e+00 : f32
    %18 = vector.broadcast %cst_9 : f32 to vector<8x128xf32>
    %19 = arith.select %17, %14, %18 : vector<8x128xi1>, vector<8x128xf32>
    %20 = arith.mulf %19, %19 : vector<8x128xf32>
    %cst_10 = arith.constant dense<0.000000e+00> : vector<8xf32>
    %21 = vector.multi_reduction <add>, %20, %cst_10 [1] : vector<8x128xf32> to vector<8xf32>
    %22 = vector.shape_cast %21 : vector<8xf32> to vector<8x1xf32>
    %cst_11 = arith.constant 3.125000e-02 : f32
    %23 = vector.broadcast %cst_11 : f32 to vector<8x1xf32>
    %24 = arith.mulf %22, %23 : vector<8x1xf32>
    %cst_12 = arith.constant 9.99999974E-6 : f32
    %25 = vector.broadcast %cst_12 : f32 to vector<8x1xf32>
    %26 = arith.addf %24, %25 : vector<8x1xf32>
    %27 = math.rsqrt %26 : vector<8x1xf32>
    %28 = vector.broadcast %27 : vector<8x1xf32> to vector<8x128xf32>
    %29 = arith.mulf %19, %28 : vector<8x128xf32>
    %30 = vector.broadcast %5 : vector<1x128xf32> to vector<8x128xf32>
    %31 = arith.mulf %29, %30 : vector<8x128xf32>
    %32 = vector.broadcast %6 : vector<1x128xf32> to vector<8x128xf32>
    %33 = arith.addf %31, %32 : vector<8x128xf32>
    %c0_13 = arith.constant 0 : index
    %c0_14 = arith.constant 0 : index
    %34 = vector.load %arg4[%c0_13, %c0_14] : memref<8x128xf32, #tpu.memory_space<vmem>>, vector<8x128xf32>
    tpu.vector_store %arg4[%c0_13, %c0_14], %33 {strides = array<i32>} : memref<8x128xf32, #tpu.memory_space<vmem>>, vector<8x128xf32>,
    return
  }
  func.func @transform_0(%arg0: i32) -> (i32, i32) {
    %c0_i32 = arith.constant 0 : i32
    %c0_i32_0 = arith.constant 0 : i32
    return %arg0, %c0_i32 : i32, i32
  }
  func.func @transform_1(%arg0: i32) -> (i32, i32) {
    %c0_i32 = arith.constant 0 : i32
    %c0_i32_0 = arith.constant 0 : i32
    %c0_i32_1 = arith.constant 0 : i32
    return %c0_i32, %c0_i32_0 : i32, i32
  }
  func.func @transform_2(%arg0: i32) -> (i32, i32) {
    %c0_i32 = arith.constant 0 : i32
    %c0_i32_0 = arith.constant 0 : i32
    %c0_i32_1 = arith.constant 0 : i32
    return %c0_i32, %c0_i32_0 : i32, i32
  }
  func.func @transform_3(%arg0: i32) -> (i32, i32) {
    %c0_i32 = arith.constant 0 : i32
    %c0_i32_0 = arith.constant 0 : i32
    return %arg0, %c0_i32 : i32, i32
  }
}

</mosaic_0001>

<bundles_post_ra>
// kernel: tpu_custom_call.1
= control target key start
LH: loop header
LB: loop body
LE: loop exit
PB: predicated region body
PF: predicated region fallthrough
CT: control target
= control target key end

     0   :  { %8 = vsyncpa [#allocation3], 0  ;;  %s853_s0 = inlined_call_operand.hbm [shape: f32[16,32], index: 0, kind: input, shape index: {}]   ;;  %s854_s1 = inlined_call_operand.hbm [shape: bf16[32,128], index: 1, kind: input, shape index: {}]   ;;  %s855_s2 = inlined_call_operand.vmem [shape: f32[3,128], index: 2, kind: input, shape index: {}]   ;;  %s856_s3 = inlined_call_operand.hbm [shape: f32[16,128], index: 3, kind: output, shape index: {}]  }
   0x1   :  { %10 = vsyncpa [#allocation3 + $0x1], 0 }
   0x2   :  { %11 = vsyncpa [#allocation6], 0 }
   0x3   :  { %12 = vsyncpa [#allocation4], 0 }
   0x4   :  { %14 = vsyncpa [#allocation4 + $0x1], 0  ;;  %s644_s12 = smov 0   ;;  %s646_s13 = smov 0  }
   0x5   :  { %s648_s14 = smov 0   ;;  %s650_s15 = smov 0  }
   0x6 LB: > { %s665_s16 = sadd.s32 4294967295, %s615_s15   ;;  %s391_s17 = sadd.s32 4294967294, %s615_s15   ;;  %s615_s15 = sphi %s650_s15, %s876_s15   ;;  %s611_s14 = sphi %s648_s14, %s875_s14   ;;  %s607_s13 = sphi %s646_s13, %s874_s13   ;;  %s603_s12 = sphi %s644_s12, %s873_s12  }
   0x7   : > { %p40_p0 = scmp.ne.s32.totalorder %s607_s13, %s603_s12  ;;  %p857_p1 = scmp.eq.s32.totalorder %s665_s16, 0 }
   0x8   : > { %p112_p3 = scmp.eq.s32.totalorder %s391_s17, 1  ;;  %p392_p5 = scmp.ge.s32.totalorder %s615_s15, 1 }
   0x9   : > { %p674_p4 = por %p857_p1, %p40_p0  ;;  %p119_p7 = scmp.lt.s32.totalorder %s615_s15, 3 }
   0xa   : > { %p679_p6 = por %p112_p3, %p40_p0  ;;  %s617_s21 = smov [#allocation5]  }
   0xb   : > { %s860_s18 = scalar_select %p674_p4, 1, 0 }
   0xc   : > { %s861_s19 = scalar_select %p679_p6, 1, 0 }
   0xd   : > { %p684_p8 = pnand %p392_p5, %p119_p7  ;;  %s131_s22 = sshll.u32 %s617_s21, 4  ;;  %s688_s22 = int_to_ptr.vmem [resolvable:$true] %s131_s22 }
   0xe   : > { %s700_s24 = sadd.s32 1, %s615_s15   ;;  %s27_s25 = sadd.s32 1, %s611_s14 }
   0xf   : > { %s862_s20 = scalar_select %p684_p8, 1, 0 }
  0x10   : > { %p430_p9 = pneg %p684_p8  ;;  %s24_s26 = ssub.s32 %s615_s15, %s700_s24 }
  0x11   : > { %s487_s29 = scalar_lea.hbm %s854_s1, 256 }
  0x12   : > { %p695_p11 = pnand %p430_p9, %p857_p1  ;;  %p488_p12 = scmp.ne.s32.totalorder %s854_s1, %s487_s29 }
  0x13   : > { %p494_p5 = scmp.lt.u32.totalorder %s487_s29, %s854_s1 }
  0x14   : > { %p489_p13 = pneg %p695_p11 }
  0x16   : > { %p490_p0 = pnand %p489_p13, %p488_p12 }
  0x18   : > { %p491_p3 = pneg %p490_p0 }
  0x1a   : > { %p496_p7 = pnand %p494_p5, %p491_p3 }
  0x1c   : > { %499 = shalt.err (!%p496_p7)
}
  0x1d   : > { %s500_s7 = scalar_lea.vmem %s688_s22, 256  ;;  %p508_p2 = scmp.lt.s32.totalorder %s688_s22, %s688_s22 }
  0x1e   : > { %p501_p9 = scmp.ne.s32.totalorder %s688_s22, %s500_s7  ;;  %p509_p6 = scmp.lt.s32.totalorder %s500_s7, %s500_s7 }
  0x20   : > { %p503_p10 = pnand %p501_p9, %p489_p13  ;;  %p510_p4 = por %p509_p6, %p508_p2 }
  0x22   : > { %p504_p1 = pneg %p503_p10 }
  0x24   : > { %p511_p8 = pnand %p510_p4, %p504_p1 }
  0x26   : > { %514 = shalt.err (!%p511_p8)
}
  0x27   : > { %s618_s8 = smov 64   ;;  %s619_s9 = smov 4  }
  0x28   : > { %433 = dma.hbm_to_vmem [thread:$0]  (!%p695_p11), %s854_s1, 256, %s688_s22, [#allocation6], %s618_s8, %s618_s8, %s619_s9  }
  0x29   : > { %p25_p2 = scmp.eq.s32.totalorder %s24_s26, 0  ;;  %p34_p1 = scmp.ne.s32.totalorder %s611_s14, %s607_s13 }
  0x2a   : > { %p35_p4 = scmp.eq.s32.totalorder %s615_s15, 0  ;;  %p443_p6 = scmp.lt.s32.totalorder %s615_s15, 2 }
  0x2b   : > { %s731_s17 = scalar_select %p25_p2, %s611_s14, %s27_s25  }
  0x2c   : > { %p36_p8 = por %p35_p4, %p34_p1  ;;  %p864_p10 = scmp.eq.s32.totalorder %s665_s16, 1 }
  0x2d   : > { %s148_s27 = sand.u32 1, %s611_s14   ;;  %s396_s28 = sshll.u32 %s615_s15, 7 }
  0x2e   : > { %p735_p12 = por %p864_p10, %p34_p1  ;;  %s395_s29 = sshll.u32 %s148_s27, 3 }
  0x2f   : > { %s744_s4 = scalar_lea.hbm %s853_s0, %s396_s28  ;;  %s152_s22 = scalar_lea.vmem [#allocation2], %s395_s29 }
  0x30   : > { %s159_s25 = sshll.u32 %s152_s22, 4  ;;  %p746_p11 = pnand %p443_p6, %p36_p8  ;;  %s750_s25 = int_to_ptr.vmem [resolvable:$true] %s159_s25 }
  0x31   : > { %s149_s5 = scalar_lea.sflag [#allocation3], %s148_s27  ;;  %s515_s6 = scalar_lea.hbm %s744_s4, 128 }
  0x32   : > { %p516_p13 = scmp.ne.s32.totalorder %s744_s4, %s515_s6  ;;  %p517_p0 = pneg %p746_p11 }
  0x33   : > { %s520_s9 = scalar_lea.hbm %s853_s0, 256  ;;  %p521_p7 = scmp.lt.u32.totalorder %s744_s4, %s853_s0 }
  0x34   : > { %p518_p3 = pnand %p517_p0, %p516_p13  ;;  %p522_p9 = scmp.lt.u32.totalorder %s520_s9, %s515_s6 }
  0x35   : > { %p524_p1 = scmp.lt.u32.totalorder %s515_s6, %s744_s4 }
  0x36   : > { %p519_p5 = pneg %p518_p3  ;;  %p523_p2 = por %p522_p9, %p521_p7 }
  0x38   : > { %p525_p4 = por %p524_p1, %p523_p2 }
  0x3a   : > { %p526_p6 = pnand %p525_p4, %p519_p5 }
  0x3c   : > { %529 = shalt.err (!%p526_p6)
}
  0x3d   : > { %s530_s27 = scalar_lea.vmem %s750_s25, 128  ;;  %s620_s28 = smov [#allocation2]  }
  0x3e   : > { %p531_p8 = scmp.ne.s32.totalorder %s750_s25, %s530_s27  ;;  %s535_s29 = sshll.u32 %s620_s28, 4  ;;  %s536_s29 = int_to_ptr.vmem [resolvable:$false] %s535_s29 }
  0x3f   : > { %s537_s23 = scalar_lea.vmem %s536_s29, 256  ;;  %p538_p3 = scmp.lt.s32.totalorder %s750_s25, %s536_s29 }
  0x40   : > { %p533_p10 = pnand %p531_p8, %p517_p0  ;;  %p539_p7 = scmp.lt.s32.totalorder %s537_s23, %s530_s27 }
  0x42   : > { %p534_p13 = pneg %p533_p10  ;;  %p540_p9 = por %p539_p7, %p538_p3 }
  0x44   : > { %p541_p2 = pnand %p540_p9, %p534_p13 }
  0x46   : > { %544 = shalt.err (!%p541_p2)
}
  0x47   : > { %437 = dma.hbm_to_vmem [thread:$0]  (!%p746_p11), %s744_s4, 128, %s750_s25, %s149_s5  }
  0x48   : > { %p867_p5 = scmp.ne.s32.totalorder %s862_s20, 0 }
  0x49   : > { %s780_s30 = sand.u32 (!%p867_p5), 1, %s607_s13   ;;  %p868_p0 = scmp.ne.s32.totalorder (!%p867_p5), %s860_s18, 0 }
  0x4a   : > { %168 = sbr.rel (%p867_p5) target bundleno = 634 (0x27a), region = 32  ;;  %s398_s22 = sshll.u32 (!%p867_p5), %s780_s30, 3 }
  0x4b   : > { %s171_s6 = scalar_lea.sflag (!%p867_p5), [#allocation3], %s780_s30  ;;  %s174_s7 = scalar_lea.vmem (!%p867_p5), [#allocation2], %s398_s22 }
  0x51   : > { %590 = dma.done.wait (%p868_p0), %s171_s6, 128  }
  0x52   : > { %592 = vsyncadd (%p868_p0), %s171_s6, 4294967168  ;;  %p869_p11 = scmp.eq.s32.totalorder %s665_s16, 0 }
  0x54   : > { %594 = dma.done.wait (%p869_p11), [#allocation6], 256   ;;  %p870_p1 = pmov %p869_p11 }
  0x55   : > { %v621_v0 = vmov 0.0   ;;  %vm622_vm0 = vmmov 0   ;;  %v483_v1 = vld [vmem:[#allocation5] sm:$0xff]   ;;  %v484_v2 = vld [vmem:[#allocation5 + $0x8] sm:$0xff]   ;;  %v202_v3 = vld [vmem:[%s174_s7] sm:$0xff]  ;;  %vm227_vm1 = vcmask 261120   ;;  %v275_v11 = vlaneseq }
  0x56   : > { %596 = vsyncadd (%p870_p1), [#allocation6], 4294967040  ;;  %414 = vmatprep.subr.bf16.mxu0 %v621_v0  ;;  %418 = vmatprep.mubr.msk.bf16.mxu0 %vm622_vm0, %v621_v0  ;;  %v203_v4 = vpack.c.bf16 %v202_v3, %v202_v3  ;;  %v401_v5 = vld [vmem:[%s855_s2] ss:$0 sm:$0xff]  ;;  %v405_v22 = vld [vmem:[%s855_s2 + $0x1] ss:$0 sm:$0xff] }
  0x57   : > { %415 = vmatpush3.bf16.msra.mxu0 %v483_v1  ;;  %v276_v12 = vand.u32 127, %v275_v11  ;;  %v406_v24 = vld [vmem:[%s855_s2 + $0x2] ss:$0 sm:$0xff]  ;;  %s408_s8 = sshll.u32 %s665_s16, 7  ;;  %s200_s9 = scalar_lea.vmem [#allocation7], %s398_s22 }
  0x58   : > { %416 = vmatprep.subr.bf16.mxu0 %v621_v0  ;;  %s311_s10 = sshll.u32 %s200_s9, 4  ;;  %s809_s28 = scalar_lea.hbm %s856_s3, %s408_s8  ;;  %s811_s10 = int_to_ptr.vmem [resolvable:$true] %s311_s10 }
  0x59   : > { %vm277_vm2 = vcmp.lt.s32.totalorder %v276_v12, 32  ;;  %s298_s29 = scalar_lea.sflag [#allocation4], %s780_s30  ;;  %s545_s23 = scalar_lea.vmem %s811_s10, 128 }
  0x5a   : > { %p546_p4 = scmp.ne.s32.totalorder %s811_s10, %s545_s23  ;;  %s623_s16 = smov [#allocation7]  }
  0x5b   : > { %417 = vmatpush3.bf16.msra.mxu0 %v484_v2  ;;  %s549_s22 = sshll.u32 %s623_s16, 4  ;;  %s550_s22 = int_to_ptr.vmem [resolvable:$false] %s549_s22 }
  0x5c   : > { %p547_p6 = pnand %p546_p4, %p735_p12  ;;  %s551_s6 = scalar_lea.vmem %s550_s22, 256 }
  0x5d   : > { %p552_p10 = scmp.lt.s32.totalorder %s811_s10, %s550_s22  ;;  %p553_p13 = scmp.lt.s32.totalorder %s551_s6, %s545_s23 }
  0x5e   : > { %419 = vmatmul.mubr.msk.bf16.vlgmr.msra.gmra.mrb[0].mxu0 %vm227_vm1, %v203_v4  ;;  %p548_p8 = pneg %p547_p6 }
  0x5f   : > { %p554_p3 = por %p553_p13, %p552_p10 }
  0x61   : > { %p555_p7 = pnand %p554_p3, %p548_p8 }
 0x131   : > { %v265_v6 = vpop.f32.mrb[0].mxu0 }
 0x132   : > { %v266_v7 = vadd.f32 %v401_v5, %v265_v6  ;;  %v420_v8 = vpop.f32.mrb[1].mxu0 }
 0x133   : > { %v268_v9 = vpop.f32.mrb[2].mxu0 }
 0x134   : > { %271 = vadd.xlane.f32.xlu0 %v266_v7  ;;  %v421_v10 = vpop.f32.mrb[3].mxu0 }
 0x1c1   : > { %v272_v13 = vpop.xlane.xlu0 %271 }
 0x1c2   : > { %v273_v14 = vmul.f32 0.03125, %v272_v13 }
 0x1c4   : > { %v274_v15 = vsub.f32 %v266_v7, %v273_v14 }
 0x1c6   : > { %v278_v16 = vsel %vm277_vm2, %v274_v15, 0.0 }
 0x1c7   : > { %v279_v17 = vmul.f32 %v278_v16, %v278_v16 }
 0x1c9   : > { %280 = vadd.xlane.f32.xlu0 %v279_v17 }
 0x256   : > { %v281_v18 = vpop.xlane.xlu0 %280 }
 0x257   : > { %v282_v19 = vmul.f32 0.03125, %v281_v18 }
 0x259   : > { %v283_v20 = vadd.f32 1e-05, %v282_v19 }
 0x25b   : > { %485 = vrsqrt.f32 %v283_v20 }
 0x265   : > { %v486_v21 = vpop.eup %485 }
 0x266   : > { %v285_v23 = vmul.f32 %v486_v21, %v278_v16 }
 0x268   : > { %v290_v25 = vmul.f32 %v405_v22, %v285_v23 }
 0x26a   : > { %v295_v26 = vadd.f32 %v406_v24, %v290_v25 }
 0x26c   : > { %296 = vst [vmem:[%s200_s9] sm:$0xff] %v295_v26 }
 0x26d   : > { %558 = shalt.err (!%p555_p7)
}
 0x26e   : > { %s559_s30 = scalar_lea.hbm %s809_s28, 128  ;;  %s563_s20 = scalar_lea.hbm %s856_s3, 256 }
 0x26f   : > { %p560_p9 = scmp.ne.s32.totalorder %s809_s28, %s559_s30  ;;  %p564_p0 = scmp.lt.u32.totalorder %s809_s28, %s856_s3 }
 0x270   : > { %p565_p11 = scmp.lt.u32.totalorder %s563_s20, %s559_s30  ;;  %p567_p4 = scmp.lt.u32.totalorder %s559_s30, %s809_s28 }
 0x271   : > { %p561_p2 = pnand %p560_p9, %p735_p12 }
 0x272   : > { %p566_p1 = por %p565_p11, %p564_p0 }
 0x273   : > { %p562_p5 = pneg %p561_p2 }
 0x274   : > { %p568_p6 = por %p567_p4, %p566_p1 }
 0x276   : > { %p569_p8 = pnand %p568_p6, %p562_p5 }
 0x278   : > { %572 = shalt.err (!%p569_p8)
}
 0x279   : > { %428 = dma.vmem_to_hbm [thread:$0]  (%p735_p12), %s811_s10, 128, %s809_s28, %s298_s29  }
 0x27a PF: > { %s323_s26 = sand.u32 1, %s603_s12   ;;  %p871_p10 = scmp.ne.s32.totalorder %s861_s19, 0 }
 0x27b   : > { %p872_p13 = scmp.ge.s32.totalorder %s615_s15, 2  ;;  %s324_s5 = scalar_lea.sflag [#allocation4], %s323_s26 }
 0x27d   : > { %p439_p3 = pnand %p872_p13, %p871_p10 }
 0x27f   : > { %598 = dma.done.wait (!%p439_p3), %s324_s5, 128  }
 0x280   : > { %600 = vsyncadd (!%p439_p3), %s324_s5, 4294967168  ;;  %p17_p7 = scmp.ge.s32.totalorder %s700_s24, 4   ;;  %s873_s12 = smov %s607_s13 }
 0x281   : > { %s874_s13 = smov %s611_s14  ;;  %s875_s14 = smov %s731_s17 }
 0x282   : > { %s876_s15 = smov %s700_s24  ;;  %19 = sbr.rel (!%p17_p7) target bundleno = 6 (0x6), region = 81 }
 0x289   :  { %329 = vsyncpa [#allocation3], 1 }
 0x28a   :  { %331 = vsyncpa [#allocation3 + $0x1], 1 }
 0x28b   :  { %332 = vsyncpa [#allocation6], 1 }
 0x28c   :  { %333 = vsyncpa [#allocation4], 1 }
 0x28d   :  { %335 = vsyncpa [#allocation4 + $0x1], 1 }

// kernel: tpu_custom_call.1
= control target key start
LH: loop header
LB: loop body
LE: loop exit
PB: predicated region body
PF: predicated region fallthrough
CT: control target
= control target key end

     0   :  { %8 = vsyncpa [#allocation3], 0  ;;  %s853_s0 = inlined_call_operand.hbm [shape: f32[16,32], index: 0, kind: input, shape index: {}]   ;;  %s854_s1 = inlined_call_operand.hbm [shape: bf16[32,128], index: 1, kind: input, shape index: {}]   ;;  %s855_s2 = inlined_call_operand.vmem [shape: f32[3,128], index: 2, kind: input, shape index: {}]   ;;  %s856_s3 = inlined_call_operand.hbm [shape: f32[16,128], index: 3, kind: output, shape index: {}]  }
   0x1   :  { %10 = vsyncpa [#allocation3 + $0x1], 0 }
   0x2   :  { %11 = vsyncpa [#allocation6], 0 }
   0x3   :  { %12 = vsyncpa [#allocation4], 0 }
   0x4   :  { %14 = vsyncpa [#allocation4 + $0x1], 0  ;;  %s644_s12 = smov 0   ;;  %s646_s13 = smov 0  }
   0x5   :  { %s648_s14 = smov 0   ;;  %s650_s15 = smov 0  }
   0x6 LB: > { %s665_s16 = sadd.s32 4294967295, %s615_s15   ;;  %s391_s17 = sadd.s32 4294967294, %s615_s15   ;;  %s615_s15 = sphi %s650_s15, %s876_s15   ;;  %s611_s14 = sphi %s648_s14, %s875_s14   ;;  %s607_s13 = sphi %s646_s13, %s874_s13   ;;  %s603_s12 = sphi %s644_s12, %s873_s12  }
   0x7   : > { %p40_p0 = scmp.ne.s32.totalorder %s607_s13, %s603_s12  ;;  %p857_p1 = scmp.eq.s32.totalorder %s665_s16, 0 }
   0x8   : > { %p112_p3 = scmp.eq.s32.totalorder %s391_s17, 1  ;;  %p392_p5 = scmp.ge.s32.totalorder %s615_s15, 1 }
   0x9   : > { %p674_p4 = por %p857_p1, %p40_p0  ;;  %p119_p7 = scmp.lt.s32.totalorder %s615_s15, 3 }
   0xa   : > { %p679_p6 = por %p112_p3, %p40_p0  ;;  %s617_s21 = smov [#allocation5]  }
   0xb   : > { %s860_s18 = scalar_select %p674_p4, 1, 0 }
   0xc   : > { %s861_s19 = scalar_select %p679_p6, 1, 0 }
   0xd   : > { %p684_p8 = pnand %p392_p5, %p119_p7  ;;  %s131_s22 = sshll.u32 %s617_s21, 4  ;;  %s688_s22 = int_to_ptr.vmem [resolvable:$true] %s131_s22 }
   0xe   : > { %s700_s24 = sadd.s32 1, %s615_s15   ;;  %s27_s25 = sadd.s32 1, %s611_s14 }
   0xf   : > { %s862_s20 = scalar_select %p684_p8, 1, 0 }
  0x10   : > { %p430_p9 = pneg %p684_p8  ;;  %s24_s26 = ssub.s32 %s615_s15, %s700_s24 }
  0x11   : > { %s487_s29 = scalar_lea.hbm %s854_s1, 256 }
  0x12   : > { %p695_p11 = pnand %p430_p9, %p857_p1  ;;  %p488_p12 = scmp.ne.s32.totalorder %s854_s1, %s487_s29 }
  0x13   : > { %p494_p5 = scmp.lt.u32.totalorder %s487_s29, %s854_s1 }
  0x14   : > { %p489_p13 = pneg %p695_p11 }
  0x16   : > { %p490_p0 = pnand %p489_p13, %p488_p12 }
  0x18   : > { %p491_p3 = pneg %p490_p0 }
  0x1a   : > { %p496_p7 = pnand %p494_p5, %p491_p3 }
  0x1c   : > { %499 = shalt.err (!%p496_p7)
}
  0x1d   : > { %s500_s7 = scalar_lea.vmem %s688_s22, 256  ;;  %p508_p2 = scmp.lt.s32.totalorder %s688_s22, %s688_s22 }
  0x1e   : > { %p501_p9 = scmp.ne.s32.totalorder %s688_s22, %s500_s7  ;;  %p509_p6 = scmp.lt.s32.totalorder %s500_s7, %s500_s7 }
  0x20   : > { %p503_p10 = pnand %p501_p9, %p489_p13  ;;  %p510_p4 = por %p509_p6, %p508_p2 }
  0x22   : > { %p504_p1 = pneg %p503_p10 }
  0x24   : > { %p511_p8 = pnand %p510_p4, %p504_p1 }
  0x26   : > { %514 = shalt.err (!%p511_p8)
}
  0x27   : > { %s618_s8 = smov 64   ;;  %s619_s9 = smov 4  }
  0x28   : > { %433 = dma.hbm_to_vmem [thread:$0]  (!%p695_p11), %s854_s1, 256, %s688_s22, [#allocation6], %s618_s8, %s618_s8, %s619_s9  }
  0x29   : > { %p25_p2 = scmp.eq.s32.totalorder %s24_s26, 0  ;;  %p34_p1 = scmp.ne.s32.totalorder %s611_s14, %s607_s13 }
  0x2a   : > { %p35_p4 = scmp.eq.s32.totalorder %s615_s15, 0  ;;  %p443_p6 = scmp.lt.s32.totalorder %s615_s15, 2 }
  0x2b   : > { %s731_s17 = scalar_select %p25_p2, %s611_s14, %s27_s25  }
  0x2c   : > { %p36_p8 = por %p35_p4, %p34_p1  ;;  %p864_p10 = scmp.eq.s32.totalorder %s665_s16, 1 }
  0x2d   : > { %s148_s27 = sand.u32 1, %s611_s14   ;;  %s396_s28 = sshll.u32 %s615_s15, 7 }
  0x2e   : > { %p735_p12 = por %p864_p10, %p34_p1  ;;  %s395_s29 = sshll.u32 %s148_s27, 3 }
  0x2f   : > { %s744_s4 = scalar_lea.hbm %s853_s0, %s396_s28  ;;  %s152_s22 = scalar_lea.vmem [#allocation2], %s395_s29 }
  0x30   : > { %s159_s25 = sshll.u32 %s152_s22, 4  ;;  %p746_p11 = pnand %p443_p6, %p36_p8  ;;  %s750_s25 = int_to_ptr.vmem [resolvable:$true] %s159_s25 }
  0x31   : > { %s149_s5 = scalar_lea.sflag [#allocation3], %s148_s27  ;;  %s515_s6 = scalar_lea.hbm %s744_s4, 128 }
  0x32   : > { %p516_p13 = scmp.ne.s32.totalorder %s744_s4, %s515_s6  ;;  %p517_p0 = pneg %p746_p11 }
  0x33   : > { %s520_s9 = scalar_lea.hbm %s853_s0, 256  ;;  %p521_p7 = scmp.lt.u32.totalorder %s744_s4, %s853_s0 }
  0x34   : > { %p518_p3 = pnand %p517_p0, %p516_p13  ;;  %p522_p9 = scmp.lt.u32.totalorder %s520_s9, %s515_s6 }
  0x35   : > { %p524_p1 = scmp.lt.u32.totalorder %s515_s6, %s744_s4 }
  0x36   : > { %p519_p5 = pneg %p518_p3  ;;  %p523_p2 = por %p522_p9, %p521_p7 }
  0x38   : > { %p525_p4 = por %p524_p1, %p523_p2 }
  0x3a   : > { %p526_p6 = pnand %p525_p4, %p519_p5 }
  0x3c   : > { %529 = shalt.err (!%p526_p6)
}
  0x3d   : > { %s530_s27 = scalar_lea.vmem %s750_s25, 128  ;;  %s620_s28 = smov [#allocation2]  }
  0x3e   : > { %p531_p8 = scmp.ne.s32.totalorder %s750_s25, %s530_s27  ;;  %s535_s29 = sshll.u32 %s620_s28, 4  ;;  %s536_s29 = int_to_ptr.vmem [resolvable:$false] %s535_s29 }
  0x3f   : > { %s537_s23 = scalar_lea.vmem %s536_s29, 256  ;;  %p538_p3 = scmp.lt.s32.totalorder %s750_s25, %s536_s29 }
  0x40   : > { %p533_p10 = pnand %p531_p8, %p517_p0  ;;  %p539_p7 = scmp.lt.s32.totalorder %s537_s23, %s530_s27 }
  0x42   : > { %p534_p13 = pneg %p533_p10  ;;  %p540_p9 = por %p539_p7, %p538_p3 }
  0x44   : > { %p541_p2 = pnand %p540_p9, %p534_p13 }
  0x46   : > { %544 = shalt.err (!%p541_p2)
}
  0x47   : > { %437 = dma.hbm_to_vmem [thread:$0]  (!%p746_p11), %s744_s4, 128, %s750_s25, %s149_s5  }
  0x48   : > { %p867_p5 = scmp.ne.s32.totalorder %s862_s20, 0 }
  0x49   : > { %s780_s30 = sand.u32 (!%p867_p5), 1, %s607_s13   ;;  %p868_p0 = scmp.ne.s32.totalorder (!%p867_p5), %s860_s18, 0 }
  0x4a   : > { %168 = sbr.rel (%p867_p5) target bundleno = 634 (0x27a), region = 32  ;;  %s398_s22 = sshll.u32 (!%p867_p5), %s780_s30, 3 }
  0x4b   : > { %s171_s6 = scalar_lea.sflag (!%p867_p5), [#allocation3], %s780_s30  ;;  %s174_s7 = scalar_lea.vmem (!%p867_p5), [#allocation2], %s398_s22 }
  0x51   : > { %590 = dma.done.wait (%p868_p0), %s171_s6, 128  }
  0x52   : > { %592 = vsyncadd (%p868_p0), %s171_s6, 4294967168  ;;  %p869_p11 = scmp.eq.s32.totalorder %s665_s16, 0 }
  0x54   : > { %594 = dma.done.wait (%p869_p11), [#allocation6], 256   ;;  %p870_p1 = pmov %p869_p11 }
  0x55   : > { %v621_v0 = vmov 0.0   ;;  %vm622_vm0 = vmmov 0   ;;  %v483_v1 = vld [vmem:[#allocation5] sm:$0xff]   ;;  %v484_v2 = vld [vmem:[#allocation5 + $0x8] sm:$0xff]   ;;  %v202_v3 = vld [vmem:[%s174_s7] sm:$0xff]  ;;  %vm227_vm1 = vcmask 261120   ;;  %v275_v11 = vlaneseq }
  0x56   : > { %596 = vsyncadd (%p870_p1), [#allocation6], 4294967040  ;;  %414 = vmatprep.subr.bf16.mxu0 %v621_v0  ;;  %418 = vmatprep.mubr.msk.bf16.mxu0 %vm622_vm0, %v621_v0  ;;  %v203_v4 = vpack.c.bf16 %v202_v3, %v202_v3  ;;  %v401_v5 = vld [vmem:[%s855_s2] ss:$0 sm:$0xff]  ;;  %v405_v22 = vld [vmem:[%s855_s2 + $0x1] ss:$0 sm:$0xff] }
  0x57   : > { %415 = vmatpush3.bf16.msra.mxu0 %v483_v1  ;;  %v276_v12 = vand.u32 127, %v275_v11  ;;  %v406_v24 = vld [vmem:[%s855_s2 + $0x2] ss:$0 sm:$0xff]  ;;  %s408_s8 = sshll.u32 %s665_s16, 7  ;;  %s200_s9 = scalar_lea.vmem [#allocation7], %s398_s22 }
  0x58   : > { %416 = vmatprep.subr.bf16.mxu0 %v621_v0  ;;  %s311_s10 = sshll.u32 %s200_s9, 4  ;;  %s809_s28 = scalar_lea.hbm %s856_s3, %s408_s8  ;;  %s811_s10 = int_to_ptr.vmem [resolvable:$true] %s311_s10 }
  0x59   : > { %vm277_vm2 = vcmp.lt.s32.totalorder %v276_v12, 32  ;;  %s298_s29 = scalar_lea.sflag [#allocation4], %s780_s30  ;;  %s545_s23 = scalar_lea.vmem %s811_s10, 128 }
  0x5a   : > { %p546_p4 = scmp.ne.s32.totalorder %s811_s10, %s545_s23  ;;  %s623_s16 = smov [#allocation7]  }
  0x5b   : > { %417 = vmatpush3.bf16.msra.mxu0 %v484_v2  ;;  %s549_s22 = sshll.u32 %s623_s16, 4  ;;  %s550_s22 = int_to_ptr.vmem [resolvable:$false] %s549_s22 }
  0x5c   : > { %p547_p6 = pnand %p546_p4, %p735_p12  ;;  %s551_s6 = scalar_lea.vmem %s550_s22, 256 }
  0x5d   : > { %p552_p10 = scmp.lt.s32.totalorder %s811_s10, %s550_s22  ;;  %p553_p13 = scmp.lt.s32.totalorder %s551_s6, %s545_s23 }
  0x5e   : > { %419 = vmatmul.mubr.msk.bf16.vlgmr.msra.gmra.mrb[0].mxu0 %vm227_vm1, %v203_v4  ;;  %p548_p8 = pneg %p547_p6 }
  0x5f   : > { %p554_p3 = por %p553_p13, %p552_p10 }
  0x61   : > { %p555_p7 = pnand %p554_p3, %p548_p8 }
 0x131   : > { %v265_v6 = vpop.f32.mrb[0].mxu0 }
 0x132   : > { %v266_v7 = vadd.f32 %v401_v5, %v265_v6  ;;  %v420_v8 = vpop.f32.mrb[1].mxu0 }
 0x133   : > { %v268_v9 = vpop.f32.mrb[2].mxu0 }
 0x134   : > { %271 = vadd.xlane.f32.xlu0 %v266_v7  ;;  %v421_v10 = vpop.f32.mrb[3].mxu0 }
 0x1c1   : > { %v272_v13 = vpop.xlane.xlu0 %271 }
 0x1c2   : > { %v273_v14 = vmul.f32 0.03125, %v272_v13 }
 0x1c4   : > { %v274_v15 = vsub.f32 %v266_v7, %v273_v14 }
 0x1c6   : > { %v278_v16 = vsel %vm277_vm2, %v274_v15, 0.0 }
 0x1c7   : > { %v279_v17 = vmul.f32 %v278_v16, %v278_v16 }
 0x1c9   : > { %280 = vadd.xlane.f32.xlu0 %v279_v17 }
 0x256   : > { %v281_v18 = vpop.xlane.xlu0 %280 }
 0x257   : > { %v282_v19 = vmul.f32 0.03125, %v281_v18 }
 0x259   : > { %v283_v20 = vadd.f32 1e-05, %v282_v19 }
 0x25b   : > { %485 = vrsqrt.f32 %v283_v20 }
 0x265   : > { %v486_v21 = vpop.eup %485 }
 0x266   : > { %v285_v23 = vmul.f32 %v486_v21, %v278_v16 }
 0x268   : > { %v290_v25 = vmul.f32 %v405_v22, %v285_v23 }
 0x26a   : > { %v295_v26 = vadd.f32 %v406_v24, %v290_v25 }
 0x26c   : > { %296 = vst [vmem:[%s200_s9] sm:$0xff] %v295_v26 }
 0x26d   : > { %558 = shalt.err (!%p555_p7)
}
 0x26e   : > { %s559_s30 = scalar_lea.hbm %s809_s28, 128  ;;  %s563_s20 = scalar_lea.hbm %s856_s3, 256 }
 0x26f   : > { %p560_p9 = scmp.ne.s32.totalorder %s809_s28, %s559_s30  ;;  %p564_p0 = scmp.lt.u32.totalorder %s809_s28, %s856_s3 }
 0x270   : > { %p565_p11 = scmp.lt.u32.totalorder %s563_s20, %s559_s30  ;;  %p567_p4 = scmp.lt.u32.totalorder %s559_s30, %s809_s28 }
 0x271   : > { %p561_p2 = pnand %p560_p9, %p735_p12 }
 0x272   : > { %p566_p1 = por %p565_p11, %p564_p0 }
 0x273   : > { %p562_p5 = pneg %p561_p2 }
 0x274   : > { %p568_p6 = por %p567_p4, %p566_p1 }
 0x276   : > { %p569_p8 = pnand %p568_p6, %p562_p5 }
 0x278   : > { %572 = shalt.err (!%p569_p8)
}
 0x279   : > { %428 = dma.vmem_to_hbm [thread:$0]  (%p735_p12), %s811_s10, 128, %s809_s28, %s298_s29  }
 0x27a PF: > { %s323_s26 = sand.u32 1, %s603_s12   ;;  %p871_p10 = scmp.ne.s32.totalorder %s861_s19, 0 }
 0x27b   : > { %p872_p13 = scmp.ge.s32.totalorder %s615_s15, 2  ;;  %s324_s5 = scalar_lea.sflag [#allocation4], %s323_s26 }
 0x27d   : > { %p439_p3 = pnand %p872_p13, %p871_p10 }
 0x27f   : > { %598 = dma.done.wait (!%p439_p3), %s324_s5, 128  }
 0x280   : > { %600 = vsyncadd (!%p439_p3), %s324_s5, 4294967168  ;;  %p17_p7 = scmp.ge.s32.totalorder %s700_s24, 4   ;;  %s873_s12 = smov %s607_s13 }
 0x281   : > { %s874_s13 = smov %s611_s14  ;;  %s875_s14 = smov %s731_s17 }
 0x282   : > { %s876_s15 = smov %s700_s24  ;;  %19 = sbr.rel (!%p17_p7) target bundleno = 6 (0x6), region = 81 }
 0x289   :  { %329 = vsyncpa [#allocation3], 1 }
 0x28a   :  { %331 = vsyncpa [#allocation3 + $0x1], 1 }
 0x28b   :  { %332 = vsyncpa [#allocation6], 1 }
 0x28c   :  { %333 = vsyncpa [#allocation4], 1 }
 0x28d   :  { %335 = vsyncpa [#allocation4 + $0x1], 1 }

</bundles_post_ra>
